<compile_context>
chip_gen: v5e
topology: v5e:2x2
jax: 0.10.0
libtpu: 0.0.40
codegen_flags: <defaults>
</compile_context>

<pallas_src>
import functools

import jax
import jax.numpy as jnp
from jax.experimental import pallas as pl
from jax.experimental.pallas import tpu as pltpu

EPS_REVIN = 1e-5


def _round_up(x, m):
    return ((x + m - 1) // m) * m


# ----------------------- fused RevIN + Linear kernel -------------------------
def fused_revin_linear_kernel(x_ref, w_ref, b_ref, o_ref, xn_ref, acc_ref,
                              *, C, L, K, tk, n_k_tiles, eps):
    """grid = (M tiles, N tiles, K tiles); K is the innermost reduction axis.

    x_ref  : (tm, C, L)  f32  raw input rows for this M tile (DMA'd once per m)
    w_ref  : (tk, tn)    cdt  streamed weight tile
    b_ref  : (1, tn)     f32  bias tile
    o_ref  : (tm, tn)    f32  output tile
    xn_ref : (tm, K_pad) cdt  scratch: RevIN-normalized, flattened activations
    acc_ref: (tm, tn)    f32  accumulator
    """
    k = pl.program_id(2)

    @pl.when(k == 0)
    def _init():
        # RevIN 'norm' (biased variance, eps inside rsqrt, no affine) with the
        # (C, L) -> C*L row-major flatten done directly into the VMEM scratch.
        # Runs at k==0 for every (m, n) pair, so it stays correct under
        # megacore splitting of the two parallel grid axes; its cost is
        # negligible next to the weight-streaming matmul.
        if xn_ref.shape[1] > K:                       # zero the K padding tail
            xn_ref[:, K:] = jnp.zeros(
                (xn_ref.shape[0], xn_ref.shape[1] - K), xn_ref.dtype)
        for c in range(C):                            # static unroll over channels
            xc = x_ref[:, c, :].astype(jnp.float32)   # (tm, L)
            mean = jnp.mean(xc, axis=-1, keepdims=True)
            cen = xc - mean
            var = jnp.mean(cen * cen, axis=-1, keepdims=True)   # biased var
            xn_ref[:, c * L:(c + 1) * L] = (
                cen * jax.lax.rsqrt(var + eps)).astype(xn_ref.dtype)
        # Fold the bias into the accumulator init (no separate epilogue pass).
        acc_ref[...] = jnp.broadcast_to(b_ref[...].astype(jnp.float32),
                                        acc_ref.shape)

    if n_k_tiles == 1:
        x_blk = xn_ref[...]
    else:
        koff = pl.multiple_of(k * tk, tk)             # tk is a multiple of 128
        x_blk = xn_ref[:, pl.ds(koff, tk)]
    acc_ref[...] += jnp.dot(x_blk, w_ref[...],
                            preferred_element_type=jnp.float32)

    @pl.when(k == n_k_tiles - 1)
    def _store():
        o_ref[...] = acc_ref[...].astype(o_ref.dtype)


# --------------------------------- Wrappers ----------------------------------
def prepare_params(weight, bias, *, seq_len, pred_len, num_channels,
                   eps=EPS_REVIN, compute_dtype=jnp.bfloat16,
                   tile_n_pref=512, vmem_budget_bytes=24 * 1024 * 1024):
    """One-time weight re-layout / cast / pad and tile selection.

    weight: (C*P, C*L) PyTorch nn.Linear layout; bias: (C*P,).
    """
    C, L, P = num_channels, seq_len, pred_len
    K, N = C * L, C * P
    weight = jnp.asarray(weight)
    bias = jnp.asarray(bias)
    assert weight.shape == (N, K) and bias.shape == (N,)

    # --- N: pad only to a multiple of 128; tn = largest 128-multiple divisor
    #     of N_pad that is <= tile_n_pref; prefer >= 2 N tiles (v7x dual TC).
    N_pad = _round_up(N, 128)
    units = N_pad // 128
    divisors = [d * 128 for d in range(1, units + 1) if units % d == 0]
    cands = [d for d in divisors if d <= tile_n_pref] or [128]
    tn = max(cands)
    if N_pad // tn < 2:
        split = [d for d in cands if N_pad // d >= 2]
        if split:
            tn = max(split)

    # --- K: trade a little zero padding (<= ~10% extra weight bytes) for
    #     larger K tiles (fewer grid steps); otherwise stay 128-aligned.
    K_pad, tk = _round_up(K, 128), 128
    for t in (512, 384, 256):
        padded = _round_up(K, t)
        if padded - K <= 0.10 * K:
            K_pad, tk = padded, t
            break

    # --- Weight (K, N) layout, padded & cast once, off the per-call path.
    w = jnp.transpose(weight)                                     # (K, N)
    w = jnp.pad(w, ((0, K_pad - K), (0, N_pad - N))).astype(compute_dtype)
    b = jnp.pad(bias.astype(jnp.float32), (0, N_pad - N)).reshape(1, N_pad)

    # --- M-tile cap from a VMEM budget: we want the whole batch in ONE M tile
    #     whenever possible so the weight streams from HBM exactly once.
    itemsize = jnp.dtype(compute_dtype).itemsize
    fixed = 2 * tk * tn * itemsize + 2 * 8 * tn * 4   # weight dbl-buf + bias
    xblk_row = _round_up(C, 8) * _round_up(L, 128) * 4
    per_tm = (2 * xblk_row            # (tm,C,L) f32 input block, double-buffered
              + K_pad * itemsize      # normalized-activation scratch row
              + tn * 4                # f32 accumulator row
              + 2 * tn * 4)           # (tm,tn) f32 output block, double-buffered
    tm_cap = (vmem_budget_bytes - fixed) // per_tm
    tm_cap = int(max(8, min(1024, (tm_cap // 8) * 8)))

    # Explicit scoped-VMEM limit: comfortably above our budget, safely below
    # v7x's 64 MiB physical VMEM (plenty of slack on v5e/v6e's 128 MiB).
    vmem_limit_bytes = 48 * 1024 * 1024

    return dict(w=w, b=b, C=C, L=L, pred_len=P, K=K, N=N,
                K_pad=K_pad, N_pad=N_pad, tk=tk, tn=tn, tm_cap=tm_cap,
                eps=eps, compute_dtype=compute_dtype,
                vmem_limit_bytes=vmem_limit_bytes)


def linear_model_forward(x, params):
    """x: (B, C, L) -> (B, C, pred_len), single fused pallas_call."""
    B, C, L = x.shape
    assert C == params["C"] and L == params["L"]
    K, N = params["K"], params["N"]
    K_pad, N_pad = params["K_pad"], params["N_pad"]
    tk, tn = params["tk"], params["tn"]
    P = params["pred_len"]
    cdt = params["compute_dtype"]

    # Batch rows: multiple of 8 sublanes; single M tile whenever VMEM allows.
    rows = _round_up(max(B, 8), 8)
    tm = min(rows, params["tm_cap"])
    B_pad = _round_up(rows, tm)
    x = x.astype(jnp.float32)
    if B_pad != B:
        x = jnp.pad(x, ((0, B_pad - B), (0, 0), (0, 0)))

    grid = (B_pad // tm, N_pad // tn, K_pad // tk)
    kernel = functools.partial(
        fused_revin_linear_kernel,
        C=C, L=L, K=K, tk=tk, n_k_tiles=grid[2], eps=params["eps"])

    out2d = pl.pallas_call(
        kernel,
        out_shape=jax.ShapeDtypeStruct((B_pad, N_pad), jnp.float32),
        grid_spec=pltpu.PrefetchScalarGridSpec(
            num_scalar_prefetch=0,
            grid=grid,
            in_specs=[
                # Raw activations: block index depends only on m, so Pallas
                # DMAs the block once per M tile (no refetch across n, k).
                pl.BlockSpec((tm, C, L), lambda m, n, k: (m, 0, 0)),
                pl.BlockSpec((tk, tn), lambda m, n, k: (k, n)),   # weight
                pl.BlockSpec((1, tn), lambda m, n, k: (0, n)),    # bias
            ],
            out_specs=pl.BlockSpec((tm, tn), lambda m, n, k: (m, n)),
            scratch_shapes=[
                pltpu.VMEM((tm, K_pad), cdt),        # normalized activations
                pltpu.VMEM((tm, tn), jnp.float32),   # accumulator
            ],
        ),
        compiler_params=pltpu.CompilerParams(
            dimension_semantics=("parallel", "parallel", "arbitrary"),
            vmem_limit_bytes=params["vmem_limit_bytes"]),
    )(x, params["w"], params["b"])

    # Final Reshape(-1, C, pred_len), dropping batch / N padding (small output).
    return out2d[:B, :N].reshape(B, C, P)


def reference_forward(x, weight, bias, *, pred_len, eps=EPS_REVIN):
    B, C, L = x.shape
    mean = jnp.mean(x, axis=-1, keepdims=True)
    var = jnp.mean((x - mean) ** 2, axis=-1, keepdims=True)
    xn = (x - mean) / jnp.sqrt(var + eps)
    y = xn.reshape(B, C * L) @ weight.T + bias
    return y.reshape(B, C, pred_len)


if __name__ == "__main__":
    # Small shapes consistent with the module defaults.
    B, C, seq_len, pred_len = 2, 4, 16, 8

    key = jax.random.PRNGKey(0)
    kx, kw, kb = jax.random.split(key, 3)
    x = jax.random.normal(kx, (B, C, seq_len), dtype=jnp.float32)

    # Deterministic parameter init (xavier_uniform-style weight), shapes
    # matching Model.__init__ for channel_independent=False.
    in_f, out_f = C * seq_len, C * pred_len
    bound = (6.0 / (in_f + out_f)) ** 0.5
    weight = jax.random.uniform(kw, (out_f, in_f), jnp.float32, -bound, bound)
    bias = 0.01 * jax.random.normal(kb, (out_f,), jnp.float32)

    ref = reference_forward(x, weight, bias, pred_len=pred_len)

    # f32 compute path: tight semantics check.
    p32 = prepare_params(weight, bias, seq_len=seq_len, pred_len=pred_len,
                         num_channels=C, compute_dtype=jnp.float32)
    out32 = jax.block_until_ready(linear_model_forward(x, p32))
    assert out32.shape == (B, C, pred_len)
    assert jnp.allclose(out32, ref, atol=1e-4, rtol=1e-4), "f32 mismatch"

    # bf16 streams (default perf config): looser tolerance for the casts.
    pbf = prepare_params(weight, bias, seq_len=seq_len, pred_len=pred_len,
                         num_channels=C)
    outbf = jax.block_until_ready(linear_model_forward(x, pbf))
    assert outbf.shape == (B, C, pred_len)
    assert jnp.allclose(outbf, ref, atol=5e-2, rtol=5e-2), "bf16 mismatch"

    print("KERNEL_OK")
</pallas_src>

<mosaic_0001>
module attributes {stable_mosaic.version = 11 : i64} {
  func.func @fused_revin_linear_kernel(%arg0: i32, %arg1: i32, %arg2: i32, %arg3: memref<8x4x16xf32, #tpu.memory_space<vmem>>, %arg4: memref<128x128xf32, #tpu.memory_space<vmem>>, %arg5: memref<1x128xf32, #tpu.memory_space<vmem>>, %arg6: memref<8x128xf32, #tpu.memory_space<vmem>>, %arg7: memref<8x128xf32, #tpu.memory_space<vmem>>, %arg8: memref<8x128xf32, #tpu.memory_space<vmem>>) attributes {dimension_semantics = [#tpu.dimension_semantics<parallel>, #tpu.dimension_semantics<parallel>, #tpu.dimension_semantics<arbitrary>], iteration_bounds = array<i64: 1, 1, 1>, scalar_prefetch = 0 : i64, scratch_operands = 2 : i64, tpu.core_type = #tpu.core_type<tc>, window_params = [{transform_indices = @transform_0, window_bounds = array<i64: 8, 4, 16>}, {transform_indices = @transform_1, window_bounds = array<i64: 128, 128>}, {transform_indices = @transform_2, window_bounds = array<i64: 1, 128>}, {transform_indices = @transform_3, window_bounds = array<i64: 8, 128>}]} {
    %c0_i32 = arith.constant 0 : i32
    %0 = arith.cmpi eq, %arg2, %c0_i32 : i32
    %1 = arith.extui %0 : i1 to i32
    %c0_i32_0 = arith.constant 0 : i32
    %2 = arith.cmpi ne, %1, %c0_i32_0 : i32
    scf.if %2 {
      %cst_10 = arith.constant 0.000000e+00 : f32
      %12 = vector.broadcast %cst_10 : f32 to vector<8x64xf32>
      %c0_11 = arith.constant 0 : index
      %c64 = arith.constant 64 : index
      %13 = vector.load %arg7[%c0_11, %c64] : memref<8x128xf32, #tpu.memory_space<vmem>>, vector<8x64xf32>
      tpu.vector_store %arg7[%c0_11, %c64], %12 {strides = array<i32>} : memref<8x128xf32, #tpu.memory_space<vmem>>, vector<8x64xf32>,
      %c0_12 = arith.constant 0 : index
      %c0_13 = arith.constant 0 : index
      %c0_14 = arith.constant 0 : index
      %14 = vector.load %arg3[%c0_12, %c0_13, %c0_14] : memref<8x4x16xf32, #tpu.memory_space<vmem>>, vector<8x1x16xf32>
      %15 = vector.shape_cast %14 : vector<8x1x16xf32> to vector<8x16xf32>
      %cst_15 = arith.constant dense<0.000000e+00> : vector<8xf32>
      %16 = vector.multi_reduction <add>, %15, %cst_15 [1] : vector<8x16xf32> to vector<8xf32>
      %17 = vector.shape_cast %16 : vector<8xf32> to vector<8x1xf32>
      %cst_16 = arith.constant 1.600000e+01 : f32
      %18 = vector.broadcast %cst_16 : f32 to vector<8x1xf32>
      %19 = arith.divf %17, %18 : vector<8x1xf32>
      %20 = vector.broadcast %19 : vector<8x1xf32> to vector<8x16xf32>
      %21 = arith.subf %15, %20 : vector<8x16xf32>
      %22 = arith.mulf %21, %21 : vector<8x16xf32>
      %cst_17 = arith.constant dense<0.000000e+00> : vector<8xf32>
      %23 = vector.multi_reduction <add>, %22, %cst_17 [1] : vector<8x16xf32> to vector<8xf32>
      %24 = vector.shape_cast %23 : vector<8xf32> to vector<8x1xf32>
      %cst_18 = arith.constant 1.600000e+01 : f32
      %25 = vector.broadcast %cst_18 : f32 to vector<8x1xf32>
      %26 = arith.divf %24, %25 : vector<8x1xf32>
      %cst_19 = arith.constant 9.99999974E-6 : f32
      %27 = vector.broadcast %cst_19 : f32 to vector<8x1xf32>
      %28 = arith.addf %26, %27 : vector<8x1xf32>
      %29 = math.rsqrt %28 : vector<8x1xf32>
      %30 = vector.broadcast %29 : vector<8x1xf32> to vector<8x16xf32>
      %31 = arith.mulf %21, %30 : vector<8x16xf32>
      %c0_20 = arith.constant 0 : index
      %c0_21 = arith.constant 0 : index
      %32 = vector.load %arg7[%c0_20, %c0_21] : memref<8x128xf32, #tpu.memory_space<vmem>>, vector<8x16xf32>
      tpu.vector_store %arg7[%c0_20, %c0_21], %31 {strides = array<i32>} : memref<8x128xf32, #tpu.memory_space<vmem>>, vector<8x16xf32>,
      %c0_22 = arith.constant 0 : index
      %c1 = arith.constant 1 : index
      %c0_23 = arith.constant 0 : index
      %33 = vector.load %arg3[%c0_22, %c1, %c0_23] : memref<8x4x16xf32, #tpu.memory_space<vmem>>, vector<8x1x16xf32>
      %34 = vector.shape_cast %33 : vector<8x1x16xf32> to vector<8x16xf32>
      %cst_24 = arith.constant dense<0.000000e+00> : vector<8xf32>
      %35 = vector.multi_reduction <add>, %34, %cst_24 [1] : vector<8x16xf32> to vector<8xf32>
      %36 = vector.shape_cast %35 : vector<8xf32> to vector<8x1xf32>
      %cst_25 = arith.constant 1.600000e+01 : f32
      %37 = vector.broadcast %cst_25 : f32 to vector<8x1xf32>
      %38 = arith.divf %36, %37 : vector<8x1xf32>
      %39 = vector.broadcast %38 : vector<8x1xf32> to vector<8x16xf32>
      %40 = arith.subf %34, %39 : vector<8x16xf32>
      %41 = arith.mulf %40, %40 : vector<8x16xf32>
      %cst_26 = arith.constant dense<0.000000e+00> : vector<8xf32>
      %42 = vector.multi_reduction <add>, %41, %cst_26 [1] : vector<8x16xf32> to vector<8xf32>
      %43 = vector.shape_cast %42 : vector<8xf32> to vector<8x1xf32>
      %cst_27 = arith.constant 1.600000e+01 : f32
      %44 = vector.broadcast %cst_27 : f32 to vector<8x1xf32>
      %45 = arith.divf %43, %44 : vector<8x1xf32>
      %cst_28 = arith.constant 9.99999974E-6 : f32
      %46 = vector.broadcast %cst_28 : f32 to vector<8x1xf32>
      %47 = arith.addf %45, %46 : vector<8x1xf32>
      %48 = math.rsqrt %47 : vector<8x1xf32>
      %49 = vector.broadcast %48 : vector<8x1xf32> to vector<8x16xf32>
      %50 = arith.mulf %40, %49 : vector<8x16xf32>
      %c0_29 = arith.constant 0 : index
      %c16 = arith.constant 16 : index
      %51 = vector.load %arg7[%c0_29, %c16] : memref<8x128xf32, #tpu.memory_space<vmem>>, vector<8x16xf32>
      tpu.vector_store %arg7[%c0_29, %c16], %50 {strides = array<i32>} : memref<8x128xf32, #tpu.memory_space<vmem>>, vector<8x16xf32>,
      %c0_30 = arith.constant 0 : index
      %c2 = arith.constant 2 : index
      %c0_31 = arith.constant 0 : index
      %52 = vector.load %arg3[%c0_30, %c2, %c0_31] : memref<8x4x16xf32, #tpu.memory_space<vmem>>, vector<8x1x16xf32>
      %53 = vector.shape_cast %52 : vector<8x1x16xf32> to vector<8x16xf32>
      %cst_32 = arith.constant dense<0.000000e+00> : vector<8xf32>
      %54 = vector.multi_reduction <add>, %53, %cst_32 [1] : vector<8x16xf32> to vector<8xf32>
      %55 = vector.shape_cast %54 : vector<8xf32> to vector<8x1xf32>
      %cst_33 = arith.constant 1.600000e+01 : f32
      %56 = vector.broadcast %cst_33 : f32 to vector<8x1xf32>
      %57 = arith.divf %55, %56 : vector<8x1xf32>
      %58 = vector.broadcast %57 : vector<8x1xf32> to vector<8x16xf32>
      %59 = arith.subf %53, %58 : vector<8x16xf32>
      %60 = arith.mulf %59, %59 : vector<8x16xf32>
      %cst_34 = arith.constant dense<0.000000e+00> : vector<8xf32>
      %61 = vector.multi_reduction <add>, %60, %cst_34 [1] : vector<8x16xf32> to vector<8xf32>
      %62 = vector.shape_cast %61 : vector<8xf32> to vector<8x1xf32>
      %cst_35 = arith.constant 1.600000e+01 : f32
      %63 = vector.broadcast %cst_35 : f32 to vector<8x1xf32>
      %64 = arith.divf %62, %63 : vector<8x1xf32>
      %cst_36 = arith.constant 9.99999974E-6 : f32
      %65 = vector.broadcast %cst_36 : f32 to vector<8x1xf32>
      %66 = arith.addf %64, %65 : vector<8x1xf32>
      %67 = math.rsqrt %66 : vector<8x1xf32>
      %68 = vector.broadcast %67 : vector<8x1xf32> to vector<8x16xf32>
      %69 = arith.mulf %59, %68 : vector<8x16xf32>
      %c0_37 = arith.constant 0 : index
      %c32 = arith.constant 32 : index
      %70 = vector.load %arg7[%c0_37, %c32] : memref<8x128xf32, #tpu.memory_space<vmem>>, vector<8x16xf32>
      tpu.vector_store %arg7[%c0_37, %c32], %69 {strides = array<i32>} : memref<8x128xf32, #tpu.memory_space<vmem>>, vector<8x16xf32>,
      %c0_38 = arith.constant 0 : index
      %c3 = arith.constant 3 : index
      %c0_39 = arith.constant 0 : index
      %71 = vector.load %arg3[%c0_38, %c3, %c0_39] : memref<8x4x16xf32, #tpu.memory_space<vmem>>, vector<8x1x16xf32>
      %72 = vector.shape_cast %71 : vector<8x1x16xf32> to vector<8x16xf32>
      %cst_40 = arith.constant dense<0.000000e+00> : vector<8xf32>
      %73 = vector.multi_reduction <add>, %72, %cst_40 [1] : vector<8x16xf32> to vector<8xf32>
      %74 = vector.shape_cast %73 : vector<8xf32> to vector<8x1xf32>
      %cst_41 = arith.constant 1.600000e+01 : f32
      %75 = vector.broadcast %cst_41 : f32 to vector<8x1xf32>
      %76 = arith.divf %74, %75 : vector<8x1xf32>
      %77 = vector.broadcast %76 : vector<8x1xf32> to vector<8x16xf32>
      %78 = arith.subf %72, %77 : vector<8x16xf32>
      %79 = arith.mulf %78, %78 : vector<8x16xf32>
      %cst_42 = arith.constant dense<0.000000e+00> : vector<8xf32>
      %80 = vector.multi_reduction <add>, %79, %cst_42 [1] : vector<8x16xf32> to vector<8xf32>
      %81 = vector.shape_cast %80 : vector<8xf32> to vector<8x1xf32>
      %cst_43 = arith.constant 1.600000e+01 : f32
      %82 = vector.broadcast %cst_43 : f32 to vector<8x1xf32>
      %83 = arith.divf %81, %82 : vector<8x1xf32>
      %cst_44 = arith.constant 9.99999974E-6 : f32
      %84 = vector.broadcast %cst_44 : f32 to vector<8x1xf32>
      %85 = arith.addf %83, %84 : vector<8x1xf32>
      %86 = math.rsqrt %85 : vector<8x1xf32>
      %87 = vector.broadcast %86 : vector<8x1xf32> to vector<8x16xf32>
      %88 = arith.mulf %78, %87 : vector<8x16xf32>
      %c0_45 = arith.constant 0 : index
      %c48 = arith.constant 48 : index
      %89 = vector.load %arg7[%c0_45, %c48] : memref<8x128xf32, #tpu.memory_space<vmem>>, vector<8x16xf32>
      tpu.vector_store %arg7[%c0_45, %c48], %88 {strides = array<i32>} : memref<8x128xf32, #tpu.memory_space<vmem>>, vector<8x16xf32>,
      %c0_46 = arith.constant 0 : index
      %c0_47 = arith.constant 0 : index
      %90 = vector.load %arg5[%c0_46, %c0_47] : memref<1x128xf32, #tpu.memory_space<vmem>>, vector<1x128xf32>
      %91 = vector.shape_cast %90 : vector<1x128xf32> to vector<1x128xf32>
      %92 = vector.broadcast %91 : vector<1x128xf32> to vector<8x128xf32>
      %c0_48 = arith.constant 0 : index
      %c0_49 = arith.constant 0 : index
      %93 = vector.load %arg8[%c0_48, %c0_49] : memref<8x128xf32, #tpu.memory_space<vmem>>, vector<8x128xf32>
      tpu.vector_store %arg8[%c0_48, %c0_49], %92 {strides = array<i32>} : memref<8x128xf32, #tpu.memory_space<vmem>>, vector<8x128xf32>,
    } else {
    }
    %c0 = arith.constant 0 : index
    %c0_1 = arith.constant 0 : index
    %3 = vector.load %arg7[%c0, %c0_1] : memref<8x128xf32, #tpu.memory_space<vmem>>, vector<8x128xf32>
    %c0_2 = arith.constant 0 : index
    %c0_3 = arith.constant 0 : index
    %4 = vector.load %arg8[%c0_2, %c0_3] : memref<8x128xf32, #tpu.memory_space<vmem>>, vector<8x128xf32>
    %c0_4 = arith.constant 0 : index
    %c0_5 = arith.constant 0 : index
    %5 = vector.load %arg4[%c0_4, %c0_5] : memref<128x128xf32, #tpu.memory_space<vmem>>, vector<128x128xf32>
    %cst = arith.constant dense<0.000000e+00> : vector<8x128xf32>
    %6 = tpu.matmul %3, %5, %cst {dimension_numbers = #tpu.dot_dimension_numbers<[1], [0], [0], [1], [0, 0, 1, 1], [], []>} : vector<8x128xf32>, vector<128x128xf32>, vector<8x128xf32> -> vector<8x128xf32>
    %7 = arith.addf %4, %6 : vector<8x128xf32>
    %c0_6 = arith.constant 0 : index
    %c0_7 = arith.constant 0 : index
    %8 = vector.load %arg8[%c0_6, %c0_7] : memref<8x128xf32, #tpu.memory_space<vmem>>, vector<8x128xf32>
    tpu.vector_store %arg8[%c0_6, %c0_7], %7 {strides = array<i32>} : memref<8x128xf32, #tpu.memory_space<vmem>>, vector<8x128xf32>,
    %c0_i32_8 = arith.constant 0 : i32
    %9 = arith.cmpi eq, %arg2, %c0_i32_8 : i32
    %10 = arith.extui %9 : i1 to i32
    %c0_i32_9 = arith.constant 0 : i32
    %11 = arith.cmpi ne, %10, %c0_i32_9 : i32
    scf.if %11 {
      %c0_10 = arith.constant 0 : index
      %c0_11 = arith.constant 0 : index
      %12 = vector.load %arg8[%c0_10, %c0_11] : memref<8x128xf32, #tpu.memory_space<vmem>>, vector<8x128xf32>
      %c0_12 = arith.constant 0 : index
      %c0_13 = arith.constant 0 : index
      %13 = vector.load %arg6[%c0_12, %c0_13] : memref<8x128xf32, #tpu.memory_space<vmem>>, vector<8x128xf32>
      tpu.vector_store %arg6[%c0_12, %c0_13], %12 {strides = array<i32>} : memref<8x128xf32, #tpu.memory_space<vmem>>, vector<8x128xf32>,
    } else {
    }
    return
  }
  func.func @transform_0(%arg0: i32, %arg1: i32, %arg2: i32) -> (i32, i32, i32) {
    %c0_i32 = arith.constant 0 : i32
    %c0_i32_0 = arith.constant 0 : i32
    %c0_i32_1 = arith.constant 0 : i32
    return %arg0, %c0_i32, %c0_i32_0 : i32, i32, i32
  }
  func.func @transform_1(%arg0: i32, %arg1: i32, %arg2: i32) -> (i32, i32) {
    %c0_i32 = arith.constant 0 : i32
    return %arg2, %arg1 : i32, i32
  }
  func.func @transform_2(%arg0: i32, %arg1: i32, %arg2: i32) -> (i32, i32) {
    %c0_i32 = arith.constant 0 : i32
    %c0_i32_0 = arith.constant 0 : i32
    return %c0_i32, %arg1 : i32, i32
  }
  func.func @transform_3(%arg0: i32, %arg1: i32, %arg2: i32) -> (i32, i32) {
    %c0_i32 = arith.constant 0 : i32
    return %arg0, %arg1 : i32, i32
  }
}

</mosaic_0001>

<bundles_post_ra>
// kernel: tpu_custom_call.1
= control target key start
LH: loop header
LB: loop body
LE: loop exit
PB: predicated region body
PF: predicated region fallthrough
CT: control target
= control target key end

     0   :  { %8 = vsyncpa [#allocation5], 0  ;;  %s1325_s0 = inlined_call_operand.hbm [shape: f32[8,4,16], index: 0, kind: input, shape index: {}]   ;;  %s1326_s1 = inlined_call_operand.hbm [shape: f32[128,128], index: 1, kind: input, shape index: {}]   ;;  %s1327_s2 = inlined_call_operand.vmem [shape: f32[1,128], index: 2, kind: input, shape index: {}]   ;;  %s1328_s3 = inlined_call_operand.hbm [shape: f32[8,128], index: 3, kind: output, shape index: {}]  }
   0x1   :  { %9 = vsyncpa [#allocation8], 0 }
   0x2   :  { %10 = vsyncpa [#allocation6], 0  ;;  %s15_s14 = sshll.u32 %s1325_s0, 4  ;;  %s858_s15 = smov [#allocation4]   ;;  %s16_s14 = int_to_ptr.hbm [resolvable:$true] %s15_s14 }
   0x3   :  { %s17_s16 = sshll.u32 %s858_s15, 4  ;;  %s28_s19 = sshll.u32 %s1326_s1, 4  ;;  %s18_s16 = int_to_ptr.vmem [resolvable:$true] %s17_s16  ;;  %s29_s19 = int_to_ptr.hbm [resolvable:$true] %s28_s19 }
   0x4   :  { %s859_s20 = smov 64   ;;  %s860_s21 = smov 4  }
   0x5   :  { %23 = dma.hbm_to_vmem [thread:$0]  %s16_s14, 512, %s18_s16, [#allocation5], %s859_s20, %s859_s20, %s860_s21  }
   0x6   :  { %s861_s22 = smov [#allocation7]   ;;  %s862_s24 = smov 128  }
   0x7   :  { %s30_s23 = sshll.u32 %s861_s22, 4  ;;  %s863_s25 = smov 8   ;;  %s31_s23 = int_to_ptr.vmem [resolvable:$true] %s30_s23 }
   0x8   :  { %36 = dma.hbm_to_vmem [thread:$0]  %s29_s19, 2048, %s31_s23, [#allocation8], %s862_s24, %s862_s24, %s863_s25  }
   0x9   :  { %852 = dma.done.wait [#allocation5], 512  }
   0xa   :  { %853 = vsyncadd [#allocation5], 4294966784 }
   0xb   :  { %854 = dma.done.wait [#allocation8], 2048  }
   0xc   :  { %855 = vsyncadd [#allocation8], 4294965248  ;;  %vm70_vm0 = vcmask 1041409   ;;  %vm73_vm1 = vcmask 1042434   ;;  %vm76_vm2 = vcmask 1043459   ;;  %vm79_vm3 = vcmask 1044484  }
   0xd   :  { %vm82_vm4 = vcmask 1045509   ;;  %vm85_vm5 = vcmask 1046534   ;;  %vm88_vm6 = vcmask 1047559   ;;  %v896_v0 = vld [vmem:[#allocation4 + $0x3] sm:$0x1]  ;;  %vm91_vm7 = vcmask 130048  }
   0xe   :  { %v898_v1 = vld [vmem:[#allocation4 + $0x7] sm:$0x1]  ;;  %v900_v2 = vld [vmem:[#allocation4 + $0xb] sm:$0x1]  ;;  %v902_v3 = vld [vmem:[#allocation4 + $0xf] sm:$0x1] }
   0xf   :  { %v904_v4 = vld [vmem:[#allocation4 + $0x13] sm:$0x1]  ;;  %v906_v5 = vld [vmem:[#allocation4 + $0x17] sm:$0x1]  ;;  %v908_v6 = vld [vmem:[#allocation4 + $0x1b] sm:$0x1] }
  0x10   :  { %v910_v7 = vld [vmem:[#allocation4 + $0x1f] sm:$0x1]  ;;  %v549_v8 = vrot.slane %v898_v1, 7  ;;  %v551_v9 = vrot.slane %v900_v2, 6  ;;  %v553_v10 = vrot.slane %v902_v3, 5  ;;  %v555_v11 = vrot.slane %v904_v4, 4 }
  0x11   :  { %v557_v12 = vrot.slane %v906_v5, 3  ;;  %v917_v13 = vld [vmem:[#allocation4 + $0x1] sm:$0x1]  ;;  %v559_v15 = vrot.slane %v908_v6, 2  ;;  %v561_v16 = vrot.slane %v910_v7, 1  ;;  %vm51_vm14 = vcmask 1048064  }
  0x12   :  { %v550_v14 = vsel %vm70_vm0, %v549_v8, %v896_v0  ;;  %v923_v17 = vld [vmem:[#allocation4 + $0x5] sm:$0x1]  ;;  %v925_v18 = vld [vmem:[#allocation4 + $0x9] sm:$0x1]  ;;  %v928_v20 = vld [vmem:[#allocation4 + $0xd] sm:$0x1] }
  0x13   :  { %v552_v19 = vsel %vm73_vm1, %v551_v9, %v550_v14  ;;  %v930_v21 = vld [vmem:[#allocation4 + $0x11] sm:$0x1]  ;;  %v932_v22 = vld [vmem:[#allocation4 + $0x15] sm:$0x1]  ;;  %v935_v24 = vld [vmem:[#allocation4 + $0x19] sm:$0x1] }
  0x14   :  { %v554_v23 = vsel %vm76_vm2, %v553_v10, %v552_v19  ;;  %v937_v25 = vld [vmem:[#allocation4 + $0x1d] sm:$0x1]  ;;  %v237_v26 = vrot.slane %v923_v17, 7  ;;  %v239_v27 = vrot.slane %v925_v18, 6  ;;  %v241_v29 = vrot.slane %v928_v20, 5  ;;  %s866_s0 = smov 48  }
  0x15   :  { %v556_v28 = vsel %vm79_vm3, %v555_v11, %v554_v23  ;;  %v243_v30 = vrot.slane %v930_v21, 4  ;;  %v245_v31 = vrot.slane %v932_v22, 3  ;;  %v945_v32 = vld [vmem:[#allocation4 + $0x2] sm:$0x1]  ;;  %v247_v35 = vrot.slane %v935_v24, 2  ;;  %s867_s1 = smov 16  }
  0x16   :  { %v558_v33 = vsel %vm82_vm4, %v557_v12, %v556_v28  ;;  %v238_v34 = vsel %vm70_vm0, %v237_v26, %v917_v13  ;;  %v249_v36 = vrot.slane %v937_v25, 1  ;;  %v952_v37 = vld [vmem:[#allocation4 + $0x6] sm:$0x1]  ;;  %v954_v38 = vld [vmem:[#allocation4 + $0xa] sm:$0x1]  ;;  %s868_s26 = smov 32  }
  0x17   :  { %v560_v39 = vsel %vm85_vm5, %v559_v15, %v558_v33  ;;  %v240_v40 = vsel %vm73_vm1, %v239_v27, %v238_v34  ;;  %v958_v41 = vld [vmem:[#allocation4 + $0xe] sm:$0x1]  ;;  %v960_v42 = vld [vmem:[#allocation4 + $0x12] sm:$0x1]  ;;  %v962_v43 = vld [vmem:[#allocation4 + $0x16] sm:$0x1] }
  0x18   :  { %v562_v44 = vsel %vm88_vm6, %v561_v16, %v560_v39  ;;  %v242_v45 = vsel %vm76_vm2, %v241_v29, %v240_v40  ;;  %v966_v46 = vld [vmem:[#allocation4 + $0x1a] sm:$0x1]  ;;  %v968_v47 = vld [vmem:[#allocation4 + $0x1e] sm:$0x1]  ;;  %v393_v48 = vrot.slane %v952_v37, 7  ;;  %v395_v49 = vrot.slane %v954_v38, 6 }
  0x19   :  { %v564_v50 = vsel %vm91_vm7, %v562_v44, 0.0  ;;  %v244_v51 = vsel %vm79_vm3, %v243_v30, %v242_v45  ;;  %v397_v52 = vrot.slane %v958_v41, 5  ;;  %v399_v53 = vrot.slane %v960_v42, 4  ;;  %v976_v54 = vld [vmem:[#allocation4] sm:$0x1]  ;;  %s869_s29 = smov [#allocation9]  }
  0x1a   :  { %565 = vadd.xlane.f32.xlu1 %v564_v50  ;;  %v246_v55 = vsel %vm82_vm4, %v245_v31, %v244_v51  ;;  %v394_v56 = vsel %vm70_vm0, %v393_v48, %v945_v32  ;;  %v401_v57 = vrot.slane %v962_v43, 3  ;;  %v982_v58 = vld [vmem:[#allocation4 + $0x4] sm:$0x1]  ;;  %v984_v59 = vld [vmem:[#allocation4 + $0x8] sm:$0x1]  ;;  %v403_v62 = vrot.slane %v966_v46, 2 }
  0x1b   :  { %v248_v60 = vsel %vm85_vm5, %v247_v35, %v246_v55  ;;  %v396_v61 = vsel %vm73_vm1, %v395_v49, %v394_v56  ;;  %v989_v63 = vld [vmem:[#allocation4 + $0xc] sm:$0x1]  ;;  %v991_v8 = vld [vmem:[#allocation4 + $0x10] sm:$0x1]  ;;  %v69_v9 = vrot.slane %v982_v58, 7  ;;  %v405_v12 = vrot.slane %v968_v47, 1 }
  0x1c   :  { %v250_v10 = vsel %vm88_vm6, %v249_v36, %v248_v60  ;;  %v398_v11 = vsel %vm76_vm2, %v397_v52, %v396_v61  ;;  %v997_v14 = vld [vmem:[#allocation4 + $0x14] sm:$0x1]  ;;  %v999_v15 = vld [vmem:[#allocation4 + $0x18] sm:$0x1]  ;;  %v1003_v23 = vld [vmem:[#allocation4 + $0x1c] sm:$0x1] }
  0x1d   :  { %v252_v16 = vsel %vm91_vm7, %v250_v10, 0.0  ;;  %v400_v19 = vsel %vm79_vm3, %v399_v53, %v398_v11  ;;  %v71_v26 = vsel %vm70_vm0, %v69_v9, %v976_v54  ;;  %v72_v27 = vrot.slane %v984_v59, 6  ;;  %s744_s30 = sshll.u32 %s869_s29, 4  ;;  %s746_s6 = sshll.u32 %s1328_s3, 4  ;;  %s745_s30 = int_to_ptr.vmem [resolvable:$true] %s744_s30  ;;  %s747_s6 = int_to_ptr.hbm [resolvable:$true] %s746_s6 }
  0x1e   :  { %253 = vadd.xlane.f32.xlu0 %v252_v16  ;;  %v402_v28 = vsel %vm82_vm4, %v401_v57, %v400_v19  ;;  %v75_v29 = vrot.slane %v989_v63, 5  ;;  %v78_v30 = vrot.slane %v991_v8, 4  ;;  %v81_v31 = vrot.slane %v997_v14, 3 }
  0x1f   :  { %v404_v33 = vsel %vm85_vm5, %v403_v62, %v402_v28  ;;  %v74_v34 = vsel %vm73_vm1, %v72_v27, %v71_v26  ;;  %v84_v35 = vrot.slane %v999_v15, 2  ;;  %v87_v40 = vrot.slane %v1003_v23, 1 }
  0x20   :  { %v406_v36 = vsel %vm88_vm6, %v405_v12, %v404_v33  ;;  %v77_v39 = vsel %vm76_vm2, %v75_v29, %v74_v34  ;;  %v864_v52 = vmov 16.0  }
  0x21   :  { %v80_v44 = vsel %vm79_vm3, %v78_v30, %v77_v39  ;;  %v408_v48 = vsel %vm91_vm7, %v406_v36, 0.0  ;;  %770 = vrcp.f32 %v864_v52 }
  0x22   :  { %v83_v45 = vsel %vm82_vm4, %v81_v31, %v80_v44 }
  0x23   :  { %v86_v49 = vsel %vm85_vm5, %v84_v35, %v83_v45 }
  0x24   :  { %v89_v50 = vsel %vm88_vm6, %v87_v40, %v86_v49 }
  0x25   :  { %v92_v51 = vsel %vm91_vm7, %v89_v50, 0.0 }
  0x26   :  { %409 = vadd.xlane.f32.xlu0 %v408_v48  ;;  %93 = vadd.xlane.f32.xlu1 %v92_v51 }
  0x27   :  { %v771_v53 = vpop.eup %770 }
  0x28   :  { %v96_v55 = vmul.f32 16.0, %v771_v53  ;;  %vm100_vm8 = vweird.f32 %v771_v53 }
  0x2a   :  { %v97_v56 = vsub.f32 1.0, %v96_v55 }
  0x2c   :  { %v98_v57 = vmul.f32 %v771_v53, %v97_v56 }
  0x2e   :  { %v99_v60 = vadd.f32 %v771_v53, %v98_v57 }
  0x30   :  { %v1024_v61 = vsel %vm100_vm8, %v771_v53, %v99_v60 }
  0x8d   :  { %v566_v62 = vpop.xlane.xlu1 %565 }
  0x8e   :  { %v567_v9 = vmul.f32 %v566_v62, %v1024_v61 }
  0x90   :  { %v569_v10 = vrot.slane %v567_v9, 1  ;;  %v570_v11 = vrot.slane %v567_v9, 2  ;;  %v571_v12 = vrot.slane %v567_v9, 3  ;;  %v572_v16 = vrot.slane %v567_v9, 4 }
  0x91   :  { %v254_v19 = vpop.xlane.xlu0 %253  ;;  %v573_v26 = vrot.slane %v567_v9, 5  ;;  %v574_v27 = vrot.slane %v567_v9, 6  ;;  %v575_v28 = vrot.slane %v567_v9, 7  ;;  %v1028_v29 = vsub.f32 %v896_v0, %v567_v9 }
  0x92   :  { %v255_v30 = vmul.f32 %v254_v19, %v1024_v61  ;;  %v1032_v31 = vsub.f32 %v898_v1, %v569_v10  ;;  %v1035_v33 = vsub.f32 %v900_v2, %v570_v11  ;;  %v1038_v34 = vsub.f32 %v902_v3, %v571_v12 }
  0x93   :  { %v1041_v35 = vsub.f32 %v904_v4, %v572_v16  ;;  %v1044_v36 = vsub.f32 %v906_v5, %v573_v26  ;;  %v1047_v0 = vsub.f32 %v908_v6, %v574_v27  ;;  %v1050_v39 = vsub.f32 %v910_v7, %v575_v28 }
  0x94   :  { %v592_v1 = vmul.f32 %v1028_v29, %v1028_v29  ;;  %v593_v2 = vmul.f32 %v1032_v31, %v1032_v31  ;;  %v594_v3 = vmul.f32 %v1035_v33, %v1035_v33  ;;  %v595_v4 = vmul.f32 %v1038_v34, %v1038_v34 }
  0x95   :  { %v596_v5 = vmul.f32 %v1041_v35, %v1041_v35  ;;  %v597_v6 = vmul.f32 %v1044_v36, %v1044_v36  ;;  %v598_v7 = vmul.f32 %v1047_v0, %v1047_v0  ;;  %v599_v40 = vmul.f32 %v1050_v39, %v1050_v39 }
  0x96   :  { %v608_v44 = vrot.slane %v593_v2, 7  ;;  %v610_v45 = vrot.slane %v594_v3, 6  ;;  %v612_v48 = vrot.slane %v595_v4, 5  ;;  %v257_v49 = vrot.slane %v255_v30, 1 }
  0x97   :  { %v614_v50 = vrot.slane %v596_v5, 4  ;;  %v616_v51 = vrot.slane %v597_v6, 3  ;;  %v618_v52 = vrot.slane %v598_v7, 2  ;;  %v620_v53 = vrot.slane %v599_v40, 1 }
  0x98   :  { %v609_v55 = vsel %vm70_vm0, %v608_v44, %v592_v1  ;;  %v258_v56 = vrot.slane %v255_v30, 2  ;;  %v259_v57 = vrot.slane %v255_v30, 3  ;;  %v260_v60 = vrot.slane %v255_v30, 4 }
  0x99   :  { %v410_v62 = vpop.xlane.xlu0 %409  ;;  %v94_v9 = vpop.xlane.xlu1 %93  ;;  %v611_v10 = vsel %vm73_vm1, %v610_v45, %v609_v55  ;;  %v261_v11 = vrot.slane %v255_v30, 5  ;;  %v262_v12 = vrot.slane %v255_v30, 6  ;;  %v263_v16 = vrot.slane %v255_v30, 7 }
  0x9a   :  { %v411_v19 = vmul.f32 %v410_v62, %v1024_v61  ;;  %v1072_v26 = vmul.f32 %v1024_v61, %v94_v9  ;;  %v613_v27 = vsel %vm76_vm2, %v612_v48, %v611_v10  ;;  %v1076_v28 = vsub.f32 %v917_v13, %v255_v30 }
  0x9b   :  { %v615_v1 = vsel %vm79_vm3, %v614_v50, %v613_v27  ;;  %v1080_v2 = vsub.f32 %v923_v17, %v257_v49  ;;  %v1083_v3 = vsub.f32 %v925_v18, %v258_v56  ;;  %v1086_v4 = vsub.f32 %v928_v20, %v259_v57 }
  0x9c   :  { %v617_v5 = vsel %vm82_vm4, %v616_v51, %v615_v1  ;;  %v1090_v6 = vsub.f32 %v930_v21, %v260_v60  ;;  %v1093_v7 = vsub.f32 %v932_v22, %v261_v11  ;;  %v1096_v13 = vsub.f32 %v935_v24, %v262_v12 }
  0x9d   :  { %v619_v17 = vsel %vm85_vm5, %v618_v52, %v617_v5  ;;  %v1100_v30 = vsub.f32 %v937_v25, %v263_v16  ;;  %v280_v18 = vmul.f32 %v1076_v28, %v1076_v28  ;;  %v281_v20 = vmul.f32 %v1080_v2, %v1080_v2 }
  0x9e   :  { %v621_v21 = vsel %vm88_vm6, %v620_v53, %v619_v17  ;;  %v282_v22 = vmul.f32 %v1083_v3, %v1083_v3  ;;  %v283_v24 = vmul.f32 %v1086_v4, %v1086_v4  ;;  %v284_v40 = vmul.f32 %v1090_v6, %v1090_v6 }
  0x9f   :  { %v623_v25 = vsel %vm91_vm7, %v621_v21, 0.0  ;;  %v285_v44 = vmul.f32 %v1093_v7, %v1093_v7  ;;  %v286_v45 = vmul.f32 %v1096_v13, %v1096_v13  ;;  %v287_v48 = vmul.f32 %v1100_v30, %v1100_v30 }
  0xa0   :  { %624 = vadd.xlane.f32.xlu0 %v623_v25  ;;  %v296_v49 = vrot.slane %v281_v20, 7  ;;  %v298_v50 = vrot.slane %v282_v22, 6  ;;  %v300_v51 = vrot.slane %v283_v24, 5  ;;  %v302_v52 = vrot.slane %v284_v40, 4 }
  0xa1   :  { %v304_v53 = vrot.slane %v285_v44, 3  ;;  %v306_v55 = vrot.slane %v286_v45, 2  ;;  %v308_v56 = vrot.slane %v287_v48, 1  ;;  %v413_v57 = vrot.slane %v411_v19, 1 }
  0xa2   :  { %v297_v60 = vsel %vm70_vm0, %v296_v49, %v280_v18  ;;  %v414_v62 = vrot.slane %v411_v19, 2  ;;  %v415_v9 = vrot.slane %v411_v19, 3  ;;  %v416_v10 = vrot.slane %v411_v19, 4 }
  0xa3   :  { %v299_v11 = vsel %vm73_vm1, %v298_v50, %v297_v60  ;;  %v417_v12 = vrot.slane %v411_v19, 5  ;;  %v418_v16 = vrot.slane %v411_v19, 6  ;;  %v419_v27 = vrot.slane %v411_v19, 7 }
  0xa4   :  { %v301_v1 = vsel %vm76_vm2, %v300_v51, %v299_v11  ;;  %v1124_v5 = vsub.f32 %v945_v32, %v411_v19  ;;  %v1127_v17 = vsub.f32 %v952_v37, %v413_v57  ;;  %v1130_v20 = vsub.f32 %v954_v38, %v414_v62 }
  0xa5   :  { %v303_v18 = vsel %vm79_vm3, %v302_v52, %v301_v1  ;;  %v1134_v21 = vsub.f32 %v958_v41, %v415_v9  ;;  %v1137_v22 = vsub.f32 %v960_v42, %v416_v10  ;;  %v1140_v24 = vsub.f32 %v962_v43, %v417_v12 }
  0xa6   :  { %v305_v32 = vsel %vm82_vm4, %v304_v53, %v303_v18  ;;  %v1144_v19 = vsub.f32 %v966_v46, %v418_v16  ;;  %v1147_v37 = vsub.f32 %v968_v47, %v419_v27  ;;  %v436_v38 = vmul.f32 %v1124_v5, %v1124_v5 }
  0xa7   :  { %v307_v41 = vsel %vm85_vm5, %v306_v55, %v305_v32  ;;  %v437_v42 = vmul.f32 %v1127_v17, %v1127_v17  ;;  %v438_v43 = vmul.f32 %v1130_v20, %v1130_v20  ;;  %v439_v40 = vmul.f32 %v1134_v21, %v1134_v21 }
  0xa8   :  { %v309_v46 = vsel %vm88_vm6, %v308_v56, %v307_v41  ;;  %v440_v47 = vmul.f32 %v1137_v22, %v1137_v22  ;;  %v441_v25 = vmul.f32 %v1140_v24, %v1140_v24  ;;  %v442_v44 = vmul.f32 %v1144_v19, %v1144_v19 }
  0xa9   :  { %v311_v45 = vsel %vm91_vm7, %v309_v46, 0.0  ;;  %v443_v48 = vmul.f32 %v1147_v37, %v1147_v37  ;;  %v452_v49 = vrot.slane %v437_v42, 7  ;;  %v454_v50 = vrot.slane %v438_v43, 6 }
  0xaa   :  { %312 = vadd.xlane.f32.xlu2 %v311_v45  ;;  %v456_v51 = vrot.slane %v439_v40, 5  ;;  %v458_v52 = vrot.slane %v440_v47, 4  ;;  %v460_v53 = vrot.slane %v441_v25, 3  ;;  %v462_v55 = vrot.slane %v442_v44, 2 }
  0xab   :  { %v453_v56 = vsel %vm70_vm0, %v452_v49, %v436_v38  ;;  %v464_v57 = vrot.slane %v443_v48, 1  ;;  %v104_v60 = vrot.slane %v1072_v26, 1  ;;  %v105_v62 = vrot.slane %v1072_v26, 2 }
  0xac   :  { %v455_v9 = vsel %vm73_vm1, %v454_v50, %v453_v56  ;;  %v106_v10 = vrot.slane %v1072_v26, 3  ;;  %v107_v11 = vrot.slane %v1072_v26, 4  ;;  %v108_v12 = vrot.slane %v1072_v26, 5 }
  0xad   :  { %v457_v16 = vsel %vm76_vm2, %v456_v51, %v455_v9  ;;  %v109_v27 = vrot.slane %v1072_v26, 6  ;;  %v110_v1 = vrot.slane %v1072_v26, 7  ;;  %v1180_v18 = vsub.f32 %v976_v54, %v1072_v26 }
  0xae   :  { %v459_v32 = vsel %vm79_vm3, %v458_v52, %v457_v16  ;;  %v1184_v38 = vsub.f32 %v982_v58, %v104_v60  ;;  %v1187_v41 = vsub.f32 %v984_v59, %v105_v62  ;;  %v1190_v42 = vsub.f32 %v989_v63, %v106_v10 }
  0xaf   :  { %v461_v43 = vsel %vm82_vm4, %v460_v53, %v459_v32  ;;  %v1194_v40 = vsub.f32 %v991_v8, %v107_v11  ;;  %v1197_v46 = vsub.f32 %v997_v14, %v108_v12  ;;  %v1200_v54 = vsub.f32 %v999_v15, %v109_v27 }
  0xb0   :  { %v463_v58 = vsel %vm85_vm5, %v462_v55, %v461_v43  ;;  %v1204_v26 = vsub.f32 %v1003_v23, %v110_v1  ;;  %v127_v59 = vmul.f32 %v1180_v18, %v1180_v18  ;;  %v128_v63 = vmul.f32 %v1184_v38, %v1184_v38 }
  0xb1   :  { %v465_v8 = vsel %vm88_vm6, %v464_v57, %v463_v58  ;;  %v129_v14 = vmul.f32 %v1187_v41, %v1187_v41  ;;  %v130_v15 = vmul.f32 %v1190_v42, %v1190_v42  ;;  %v131_v47 = vmul.f32 %v1194_v40, %v1194_v40 }
  0xb2   :  { %v467_v23 = vsel %vm91_vm7, %v465_v8, 0.0  ;;  %v132_v25 = vmul.f32 %v1197_v46, %v1197_v46  ;;  %v133_v44 = vmul.f32 %v1200_v54, %v1200_v54  ;;  %v134_v45 = vmul.f32 %v1204_v26, %v1204_v26 }
  0xb3   :  { %468 = vadd.xlane.f32.xlu2 %v467_v23  ;;  %v143_v48 = vrot.slane %v128_v63, 7  ;;  %v145_v49 = vrot.slane %v129_v14, 6  ;;  %v147_v50 = vrot.slane %v130_v15, 5  ;;  %v149_v51 = vrot.slane %v131_v47, 4 }
  0xb4   :  { %v151_v53 = vrot.slane %v132_v25, 3  ;;  %v153_v56 = vrot.slane %v133_v44, 2  ;;  %v155_v60 = vrot.slane %v134_v45, 1 }
  0xb5   :  { %v144_v52 = vsel %vm70_vm0, %v143_v48, %v127_v59 }
  0xb6   :  { %v146_v55 = vsel %vm73_vm1, %v145_v49, %v144_v52 }
  0xb7   :  { %v148_v57 = vsel %vm76_vm2, %v147_v50, %v146_v55 }
  0xb8   :  { %v150_v62 = vsel %vm79_vm3, %v149_v51, %v148_v57 }
  0xb9   :  { %v152_v9 = vsel %vm82_vm4, %v151_v53, %v150_v62 }
  0xba   :  { %v154_v10 = vsel %vm85_vm5, %v153_v56, %v152_v9 }
  0xbb   :  { %v156_v11 = vsel %vm88_vm6, %v155_v60, %v154_v10 }
  0xbc   :  { %v158_v12 = vsel %vm91_vm7, %v156_v11, 0.0 }
  0xbd   :  { %159 = vadd.xlane.f32.xlu1 %v158_v12 }
 0x113   :  { %v625_v16 = vpop.xlane.xlu0 %624 }
 0x114   :  { %v626_v27 = vmul.f32 %v625_v16, %v1024_v61 }
 0x116   :  { %v627_v1 = vadd.f32 1e-05, %v626_v27 }
 0x118   :  { %772 = vrsqrt.f32 %v627_v1  ;;  %vm634_vm10 = vweird.f32 %v627_v1 }
 0x11d   :  { %v313_v32 = vpop.xlane.xlu2 %312 }
 0x11e   :  { %v773_v43 = vpop.eup %772  ;;  %v314_v58 = vmul.f32 %v313_v32, %v1024_v61 }
 0x11f   :  { %v629_v59 = vmul.f32 %v773_v43, %v627_v1  ;;  %vm635_vm9 = vweird.f32 %v773_v43 }
 0x120   :  { %v315_v63 = vadd.f32 1e-05, %v314_v58  ;;  %vm636_vm11 = vmor %vm634_vm10, %vm635_vm9 }
 0x121   :  { %v630_v8 = vmul.f32 %v773_v43, %v629_v59 }
 0x122   :  { %774 = vrsqrt.f32 %v315_v63  ;;  %vm322_vm13 = vweird.f32 %v315_v63 }
 0x123   :  { %v631_v14 = vmul.f32 0.5, %v630_v8 }
 0x125   :  { %v632_v15 = vsub.f32 1.5, %v631_v14 }
 0x126   :  { %v469_v47 = vpop.xlane.xlu2 %468 }
 0x127   :  { %v633_v23 = vmul.f32 %v773_v43, %v632_v15  ;;  %v470_v25 = vmul.f32 %v469_v47, %v1024_v61 }
 0x128   :  { %v775_v44 = vpop.eup %774 }
 0x129   :  { %v317_v45 = vmul.f32 %v775_v44, %v315_v63  ;;  %v637_v48 = vsel %vm636_vm11, %v773_v43, %v633_v23  ;;  %v1235_v49 = vadd.f32 1e-05, %v470_v25  ;;  %vm323_vm12 = vweird.f32 %v775_v44 }
 0x12a   :  { %v639_v50 = vrot.slane %v637_v48, 1  ;;  %v640_v51 = vrot.slane %v637_v48, 2  ;;  %v641_v52 = vrot.slane %v637_v48, 3  ;;  %v642_v53 = vrot.slane %v637_v48, 4  ;;  %vm324_vm15 = vmor %vm322_vm13, %vm323_vm12 }
 0x12b   :  { %v318_v55 = vmul.f32 %v775_v44, %v317_v45  ;;  %776 = vrsqrt.f32 %v1235_v49  ;;  %v643_v56 = vrot.slane %v637_v48, 5  ;;  %v644_v57 = vrot.slane %v637_v48, 6 }
 0x12c   :  { %v645_v60 = vrot.slane %v637_v48, 7  ;;  %v655_v62 = vmul.f32 %v639_v50, %v1032_v31  ;;  %v656_v10 = vmul.f32 %v640_v51, %v1035_v33  ;;  %v657_v11 = vmul.f32 %v641_v52, %v1038_v34 }
 0x12d   :  { %v319_v9 = vmul.f32 0.5, %v318_v55  ;;  %v654_v12 = vmul.f32 %v637_v48, %v1028_v29  ;;  %v658_v16 = vmul.f32 %v642_v53, %v1041_v35  ;;  %v659_v27 = vmul.f32 %v643_v56, %v1044_v36 }
 0x12e   :  { %v670_v1 = vrot.slane %v655_v62, 7  ;;  %v1245_v43 = vmul.f32 %v644_v57, %v1047_v0  ;;  %v672_v58 = vrot.slane %v656_v10, 6  ;;  %v1248_v59 = vmul.f32 %v645_v60, %v1050_v39 }
 0x12f   :  { %v320_v32 = vsub.f32 1.5, %v319_v9  ;;  %v674_v34 = vrot.slane %v657_v11, 5  ;;  %vm478_vm8 = vweird.f32 %v1235_v49  ;;  %v676_v63 = vrot.slane %v658_v16, 4 }
 0x130   :  { %v160_v31 = vpop.xlane.xlu1 %159  ;;  %v671_v33 = vsel %vm70_vm0, %v670_v1, %v654_v12  ;;  %v678_v14 = vrot.slane %v659_v27, 3  ;;  %v680_v23 = vrot.slane %v1245_v43, 2  ;;  %v865_v25 = vmov 0.0  }
 0x131   :  { %v777_v29 = vpop.eup %776  ;;  %v321_v8 = vmul.f32 %v775_v44, %v320_v32  ;;  %v161_v35 = vmul.f32 %v160_v31, %v1024_v61  ;;  %v673_v36 = vsel %vm73_vm1, %v672_v58, %v671_v33  ;;  %52 = vst.msk [vmem:[#allocation2] sm:$0xff] %vm51_vm14, %v865_v25  ;;  %v682_v43 = vrot.slane %v1248_v59, 1 }
 0x132   :  { %v473_v0 = vmul.f32 %v777_v29, %v1235_v49  ;;  %v675_v47 = vsel %vm76_vm2, %v674_v34, %v673_v36  ;;  %vm479_vm9 = vweird.f32 %v777_v29 }
 0x133   :  { %v325_v15 = vsel %vm324_vm15, %v775_v44, %v321_v8  ;;  %v1255_v39 = vadd.f32 1e-05, %v161_v35  ;;  %v677_v56 = vsel %vm79_vm3, %v676_v63, %v675_v47  ;;  %vm480_vm11 = vmor %vm478_vm8, %vm479_vm9 }
 0x134   :  { %v474_v61 = vmul.f32 %v777_v29, %v473_v0  ;;  %v327_v45 = vrot.slane %v325_v15, 1  ;;  %v328_v48 = vrot.slane %v325_v15, 2  ;;  %v329_v50 = vrot.slane %v325_v15, 3 }
 0x135   :  { %778 = vrsqrt.f32 %v1255_v39  ;;  %v330_v51 = vrot.slane %v325_v15, 4  ;;  %v331_v52 = vrot.slane %v325_v15, 5  ;;  %v332_v55 = vrot.slane %v325_v15, 6 }
 0x136   :  { %v475_v53 = vmul.f32 0.5, %v474_v61  ;;  %v333_v44 = vrot.slane %v325_v15, 7  ;;  %v343_v57 = vmul.f32 %v327_v45, %v1080_v2  ;;  %v344_v60 = vmul.f32 %v328_v48, %v1083_v3 }
 0x137   :  { %v345_v62 = vmul.f32 %v329_v50, %v1086_v4  ;;  %v346_v9 = vmul.f32 %v330_v51, %v1090_v6  ;;  %v347_v11 = vmul.f32 %v331_v52, %v1093_v7  ;;  %v348_v12 = vmul.f32 %v332_v55, %v1096_v13 }
 0x138   :  { %v476_v10 = vsub.f32 1.5, %v475_v53  ;;  %v349_v16 = vmul.f32 %v333_v44, %v1100_v30  ;;  %v342_v27 = vmul.f32 %v325_v15, %v1076_v28  ;;  %v358_v1 = vrot.slane %v343_v57, 7 }
 0x139   :  { %v360_v32 = vrot.slane %v344_v60, 6  ;;  %vm169_vm10 = vweird.f32 %v1255_v39  ;;  %v362_v3 = vrot.slane %v345_v62, 5  ;;  %v364_v4 = vrot.slane %v346_v9, 4 }
 0x13a   :  { %v477_v2 = vmul.f32 %v777_v29, %v476_v10  ;;  %v359_v6 = vsel %vm70_vm0, %v358_v1, %v342_v27  ;;  %v366_v7 = vrot.slane %v347_v11, 3  ;;  %v368_v13 = vrot.slane %v348_v12, 2 }
 0x13b   :  { %v779_v58 = vpop.eup %778  ;;  %v679_v28 = vsel %vm82_vm4, %v678_v14, %v677_v56  ;;  %v361_v59 = vsel %vm73_vm1, %v360_v32, %v359_v6  ;;  %v370_v33 = vrot.slane %v349_v16, 1 }
 0x13c   :  { %v481_v30 = vsel %vm480_vm11, %v777_v29, %v477_v2  ;;  %v164_v31 = vmul.f32 %v779_v58, %v1255_v39  ;;  %v363_v34 = vsel %vm76_vm2, %v362_v3, %v361_v59  ;;  %v681_v8 = vsel %vm85_vm5, %v680_v23, %v679_v28 }
 0x13d   :  { %v483_v35 = vrot.slane %v481_v30, 1  ;;  %v484_v36 = vrot.slane %v481_v30, 2  ;;  %v365_v0 = vsel %vm79_vm3, %v364_v4, %v363_v34  ;;  %v683_v63 = vsel %vm88_vm6, %v682_v43, %v681_v8 }
 0x13e   :  { %v165_v49 = vmul.f32 %v779_v58, %v164_v31  ;;  %v485_v15 = vrot.slane %v481_v30, 3  ;;  %vm170_vm12 = vweird.f32 %v779_v58  ;;  %v367_v29 = vsel %vm82_vm4, %v366_v7, %v365_v0  ;;  %684 = vrot.lane.b32.xlu1 %v683_v63, %s866_s0 }
 0x13f   :  { %v486_v14 = vrot.slane %v481_v30, 4  ;;  %v487_v47 = vrot.slane %v481_v30, 5  ;;  %v369_v61 = vsel %vm85_vm5, %v368_v13, %v367_v29  ;;  %v488_v45 = vrot.slane %v481_v30, 6  ;;  %vm171_vm13 = vmor %vm169_vm10, %vm170_vm12  ;;  %v709_v29 = vld [vmem:[#allocation7 + $0x68] sm:$0xff] }
 0x140   :  { %v166_v25 = vmul.f32 0.5, %v165_v49  ;;  %v489_v23 = vrot.slane %v481_v30, 7  ;;  %v371_v48 = vsel %vm88_vm6, %v370_v33, %v369_v61  ;;  %v499_v50 = vmul.f32 %v483_v35, %v1127_v17  ;;  %v705_v61 = vld [vmem:[#allocation7 + $0x48] sm:$0xff] }
 0x141   :  { %v500_v51 = vmul.f32 %v484_v36, %v1130_v20  ;;  %v501_v52 = vmul.f32 %v485_v15, %v1134_v21  ;;  %372 = vrot.lane.b32.xlu2 %v371_v48, %s867_s1  ;;  %v502_v55 = vmul.f32 %v486_v14, %v1137_v22  ;;  %v503_v44 = vmul.f32 %v487_v47, %v1140_v24  ;;  %v710_v15 = vld [vmem:[#allocation7 + $0x70] sm:$0xff]  ;;  %v708_v14 = vld [vmem:[#allocation7 + $0x60] sm:$0xff]  ;;  %v707_v47 = vld [vmem:[#allocation7 + $0x58] sm:$0xff] }
 0x142   :  { %v167_v53 = vsub.f32 1.5, %v166_v25  ;;  %v498_v56 = vmul.f32 %v481_v30, %v1124_v5  ;;  %v514_v57 = vrot.slane %v499_v50, 7  ;;  %v504_v20 = vmul.f32 %v488_v45, %v1144_v19  ;;  %v706_v25 = vld [vmem:[#allocation7 + $0x50] sm:$0xff]  ;;  %v704_v45 = vld [vmem:[#allocation7 + $0x40] sm:$0xff]  ;;  %v701_v50 = vld [vmem:[#allocation7 + $0x28] sm:$0xff] }
 0x143   :  { %v516_v60 = vrot.slane %v500_v51, 6  ;;  %v505_v21 = vmul.f32 %v489_v23, %v1147_v37  ;;  %v518_v9 = vrot.slane %v501_v52, 5  ;;  %v520_v24 = vrot.slane %v502_v55, 4  ;;  %v703_v23 = vld [vmem:[#allocation7 + $0x38] sm:$0xff]  ;;  %v702_v48 = vld [vmem:[#allocation7 + $0x30] sm:$0xff]  ;;  %v700_v52 = vld [vmem:[#allocation7 + $0x20] sm:$0xff] }
 0x144   :  { %v168_v17 = vmul.f32 %v779_v58, %v167_v53  ;;  %v515_v62 = vsel %vm70_vm0, %v514_v57, %v498_v56  ;;  %v522_v11 = vrot.slane %v503_v44, 3  ;;  %v524_v1 = vrot.slane %v504_v20, 2  ;;  %v699_v53 = vld [vmem:[#allocation7 + $0x18] sm:$0xff]  ;;  %v698_v55 = vld [vmem:[#allocation7 + $0x10] sm:$0xff]  ;;  %v697_v44 = vld [vmem:[#allocation7 + $0x8] sm:$0xff] }
 0x145   :  { %v517_v22 = vsel %vm73_vm1, %v516_v60, %v515_v62  ;;  %v696_v56 = vld [vmem:[#allocation7] sm:$0xff]  ;;  %v769_v20 = vld [vmem:[%s1327_s2] ss:$0 sm:$0xff] }
 0x146   :  { %v172_v10 = vsel %vm171_vm13, %v779_v58, %v168_v17  ;;  %v519_v5 = vsel %vm76_vm2, %v518_v9, %v517_v22  ;;  %v526_v58 = vrot.slane %v505_v21, 1 }
 0x147   :  { %v174_v12 = vrot.slane %v172_v10, 1  ;;  %v175_v39 = vrot.slane %v172_v10, 2  ;;  %v176_v16 = vrot.slane %v172_v10, 3  ;;  %v177_v27 = vrot.slane %v172_v10, 4 }
 0x148   :  { %v178_v32 = vrot.slane %v172_v10, 5  ;;  %v179_v43 = vrot.slane %v172_v10, 6  ;;  %v521_v2 = vsel %vm79_vm3, %v520_v24, %v519_v5  ;;  %v180_v3 = vrot.slane %v172_v10, 7 }
 0x149   :  { %v190_v19 = vmul.f32 %v174_v12, %v1184_v38  ;;  %v191_v37 = vmul.f32 %v175_v39, %v1187_v41  ;;  %v523_v4 = vsel %vm82_vm4, %v522_v11, %v521_v2  ;;  %v192_v6 = vmul.f32 %v176_v16, %v1190_v42 }
 0x14a   :  { %v193_v7 = vmul.f32 %v177_v27, %v1194_v40  ;;  %v189_v13 = vmul.f32 %v172_v10, %v1180_v18  ;;  %v525_v30 = vsel %vm85_vm5, %v524_v1, %v523_v4  ;;  %v194_v31 = vmul.f32 %v178_v32, %v1197_v46 }
 0x14b   :  { %v205_v28 = vrot.slane %v190_v19, 7  ;;  %v527_v38 = vsel %vm88_vm6, %v526_v58, %v525_v30  ;;  %v195_v41 = vmul.f32 %v179_v43, %v1200_v54  ;;  %v207_v59 = vrot.slane %v191_v37, 6 }
 0x14c   :  { %528 = vrot.lane.b32.xlu0 %v527_v38, %s868_s26  ;;  %v196_v33 = vmul.f32 %v180_v3, %v1204_v26  ;;  %v209_v34 = vrot.slane %v192_v6, 5  ;;  %v211_v18 = vrot.slane %v193_v7, 4  ;;  %v213_v35 = vrot.slane %v194_v31, 3  ;;  %v711_v26 = vld [vmem:[#allocation7 + $0x78] sm:$0xff] }
 0x14d   :  { %v206_v42 = vsel %vm70_vm0, %v205_v28, %v189_v13  ;;  %v215_v36 = vrot.slane %v195_v41, 2  ;;  %712 = vmatpush.msra.mxu0 %v711_v26  ;;  %vm375_vm0 = vcmask 261248  }
 0x14e   :  { %v208_v40 = vsel %vm73_vm1, %v207_v59, %v206_v42  ;;  %v217_v54 = vrot.slane %v196_v33, 1  ;;  %vm531_vm1 = vcmask 392448  }
 0x14f   :  { %v210_v8 = vsel %vm76_vm2, %v209_v34, %v208_v40  ;;  %713 = vmatpush.msra.mxu0 %v710_v15  ;;  %vm687_vm2 = vcmask 523648  }
 0x150   :  { %v212_v46 = vsel %vm79_vm3, %v211_v18, %v210_v8 }
 0x151   :  { %v214_v49 = vsel %vm82_vm4, %v213_v35, %v212_v46  ;;  %714 = vmatpush.msra.mxu0 %v709_v29 }
 0x152   :  { %v216_v0 = vsel %vm85_vm5, %v215_v36, %v214_v49 }
 0x153   :  { %v218_v63 = vsel %vm88_vm6, %v217_v54, %v216_v0  ;;  %715 = vmatpush.msra.mxu0 %v708_v14 }
 0x154   :  { %220 = vst.msk [vmem:[#allocation2] sm:$0xff] %vm91_vm7, %v218_v63 }
 0x155   :  { %716 = vmatpush.msra.mxu0 %v707_v47 }
 0x157   :  { %717 = vmatpush.msra.mxu0 %v706_v25 }
 0x159   :  { %718 = vmatpush.msra.mxu0 %v705_v61 }
 0x15b   :  { %719 = vmatpush.msra.mxu0 %v704_v45 }
 0x15d   :  { %720 = vmatpush.msra.mxu0 %v703_v23 }
 0x15f   :  { %721 = vmatpush.msra.mxu0 %v702_v48 }
 0x161   :  { %722 = vmatpush.msra.mxu0 %v701_v50 }
 0x163   :  { %723 = vmatpush.msra.mxu0 %v700_v52 }
 0x165   :  { %724 = vmatpush.msra.mxu0 %v699_v53 }
 0x167   :  { %725 = vmatpush.msra.mxu0 %v698_v55 }
 0x169   :  { %726 = vmatpush.msra.mxu0 %v697_v44 }
 0x16b   :  { %727 = vmatpush.msra.mxu0 %v696_v56 }
 0x19b   :  { %v373_v51 = vpop.permute.xlu2 %372 }
 0x19c   :  { %376 = vst.msk [vmem:[#allocation2] sm:$0xff] %vm375_vm0, %v373_v51 }
 0x1b0   :  { %v685_v60 = vpop.permute.xlu1 %684 }
 0x1be   :  { %v529_v57 = vpop.permute.xlu0 %528 }
 0x1bf   :  { %532 = vst.msk [vmem:[#allocation2] sm:$0xff] %vm531_vm1, %v529_v57 }
 0x1c0   :  { %688 = vst.msk [vmem:[#allocation2] sm:$0xff] %vm687_vm2, %v685_v60 }
 0x1c7   :  { %v694_v17 = vld [vmem:[#allocation2] sm:$0xff] }
 0x1c8   :  { %728 = vmatmul.f32.vlgmr.msra.gmra.mxu0 %v694_v17 }
 0x245   :  { %v729_v21 = vpop.f32.mrf.mxu0 }
 0x246   :  { %v732_v62 = vadd.f32 %v769_v20, %v729_v21 }
 0x248   :  { %738 = vst [vmem:[#allocation9] sm:$0xff] %v732_v62 }
 0x249   :  { %749 = dma.vmem_to_hbm [thread:$0]  %s745_s30, 128, %s747_s6, [#allocation6]  }
 0x24a   :  { %856 = dma.done.wait [#allocation6], 128  }
 0x24b   :  { %857 = vsyncadd [#allocation6], 4294967168 }
 0x24c   :  { %754 = vsyncpa [#allocation5], 1 }
 0x24d   :  { %755 = vsyncpa [#allocation8], 1 }
 0x24e   :  { %756 = vsyncpa [#allocation6], 1 }

</bundles_post_ra>
